<compile_context>
chip_gen: v7x
topology: tpu7x:2x2x1
jax: 0.10.0
libtpu: 0.0.40
codegen_flags: <defaults>
</compile_context>

<pallas_src>
import jax
import jax.numpy as jnp
from jax.experimental import pallas as pl
from jax.experimental.pallas import tpu as pltpu

KH = 7          # conv kernel height
PAD = 3         # replicate pad on each side of H
_LANE = 128
_SUBLANE = 8
_CHUNK_BYTES = 32 * 1024      # per-chunk x footprint -> live vregs stay small
_MAX_UNROLL = 128             # cap on unrolled (image x chunk) iterations / block


# ----------------------------------------------------------------------------
# In-kernel compute
# ----------------------------------------------------------------------------
def _conv7_chunk(x, w, H):
    """Replicate-pad 7-tap conv along axis 0 of an (H, cw) f32 value.

    Single-pass, vreg/VMEM-resident accumulator: 6 pltpu.roll's (XLU) + row-mask
    selects fold the edge-clamped boundary rows in, so the caller does exactly
    one load and one store per chunk.
    """
    cw = x.shape[1]
    acc = w[PAD] * x
    if H == 1:
        # Every tap clamps to row 0.
        return acc + (w[0] + w[1] + w[2] + w[4] + w[5] + w[6]) * x

    row = jax.lax.broadcasted_iota(jnp.int32, (H, cw), 0)
    top = jnp.broadcast_to(x[0:1, :], (H, cw))          # replicate row 0
    bot = jnp.broadcast_to(x[H - 1:H, :], (H, cw))      # replicate row H-1

    for k in range(KH):
        s = k - PAD
        if s == 0:
            continue
        # rolled[h] = x[(h + s) mod H]  (wrapped rows are fixed by the select)
        rolled = pltpu.roll(x, shift=(-s) % H, axis=0)
        if s < 0:
            tap = jnp.where(row >= -s, rolled, top)      # h + s < 0  -> row 0
        else:
            tap = jnp.where(row < H - s, rolled, bot)    # h + s > H-1 -> row H-1
        acc = acc + w[k] * tap
    return acc


def _make_kernel(H, BT, CW):
    """Kernel over (BT*H, TW) blocks: BT images stacked along sublanes."""

    def kernel(w_ref, x_ref, o_ref):
        # w_ref: (7,) f32 SMEM; x_ref/o_ref: (BT*H, TW) VMEM blocks.
        # Hoist the 7 scalar weight reads out of every loop.
        w = [w_ref[k].astype(jnp.float32) for k in range(KH)]
        TW = x_ref.shape[1]
        for bt in range(BT):
            r0 = bt * H
            c0 = 0
            while c0 < TW:                      # lane strip-mining
                cw = min(CW, TW - c0)
                xc = x_ref[r0:r0 + H, c0:c0 + cw].astype(jnp.float32)
                oc = _conv7_chunk(xc, w, H)
                o_ref[r0:r0 + H, c0:c0 + cw] = oc.astype(o_ref.dtype)
                c0 += cw

    return kernel


# ----------------------------------------------------------------------------
# Sizing / planning helpers
# ----------------------------------------------------------------------------
def _vmem_capacity_bytes():
    try:
        info = pltpu.get_tpu_info()
        return int(getattr(info, "vmem_capacity_bytes", 64 * 1024 * 1024))
    except Exception:
        return 64 * 1024 * 1024    # conservative (v7x-sized) fallback


def _hw_plan():
    vmem = _vmem_capacity_bytes()
    small_vmem = vmem <= 64 * 1024 * 1024      # v7x-like: 64 MiB VMEM, 2 TCs
    target_block = (4 if small_vmem else 12) * 1024 * 1024
    return vmem, small_vmem, target_block


def _vmem_limit(vmem, block_bytes):
    need = 6 * block_bytes + (1 << 20)         # 2x double-buffered in+out + slack
    cap = (vmem * 3) // 4                      # never run at the physical limit
    return int(max(16 * 1024 * 1024, min(cap, need)))


def _chunk_cols(H):
    cols = max(1, _CHUNK_BYTES // (H * 4))
    return max(_LANE, (cols // _LANE) * _LANE)


def _pick_bt(NC, H, bt_target):
    """Largest divisor of NC <= bt_target keeping the block sublane dim legal
    ((BT*H) % 8 == 0, or BT == NC so the block spans the full dim)."""
    best = None
    for bt in range(1, min(NC, max(1, bt_target)) + 1):
        if NC % bt:
            continue
        if (bt * H) % _SUBLANE == 0 or bt == NC:
            best = bt
    return best


# ----------------------------------------------------------------------------
# pallas_call wrapper
# ----------------------------------------------------------------------------
def _run(x2d, weight, *, H, BT, block, grid, CW, vmem_limit):
    kernel = _make_kernel(H, BT, CW)
    return pl.pallas_call(
        kernel,
        out_shape=jax.ShapeDtypeStruct(x2d.shape, x2d.dtype),
        grid=grid,
        in_specs=[
            pl.BlockSpec(memory_space=pltpu.MemorySpace.SMEM),   # 7-tap weight
            # TODO(synk): if xprof shows exposed DMA on v7x, add
            # pipeline_mode=pl.Buffered(3) here (and on out_specs).
            pl.BlockSpec(block, lambda i, j: (i, j)),
        ],
        out_specs=pl.BlockSpec(block, lambda i, j: (i, j)),
        compiler_params=pltpu.CompilerParams(
            dimension_semantics=("parallel", "parallel"),
            vmem_limit_bytes=vmem_limit,
        ),
    )(weight, x2d)


def forfilter(x, weight):
    """x: (N, C, H, W); weight: (7,) (or (1,1,7,1)) shared replicate-pad 7x1 conv."""
    N, C, H, W = x.shape
    weight = jnp.asarray(weight, dtype=jnp.float32).reshape(-1)
    NC = N * C
    vmem, small_vmem, target = _hw_plan()
    CW = _chunk_cols(H)

    # ---- native-layout path (W in lanes; free reshapes, no HBM relayout) ----
    if W >= _LANE:
        img_bytes = H * W * 4
        plan = None
        if img_bytes <= target:
            bt_cap = max(1, _MAX_UNROLL // max(1, pl.cdiv(W, min(CW, W))))
            bt = _pick_bt(NC, H, min(bt_cap, max(1, target // img_bytes)))
            if bt is not None:
                # v7x: keep >= 2 grid steps so both TensorCores get work.
                if small_vmem and NC // bt < 2 and NC >= 2:
                    bt2 = _pick_bt(NC, H, max(1, NC // 2))
                    if bt2 is not None:
                        bt = bt2
                plan = (bt, W)
        elif H % _SUBLANE == 0 or NC == 1:
            # Single image too big for one block -> tile W by lane multiples.
            tw = max(_LANE, (target // (H * 4)) // _LANE * _LANE)
            tw = min(tw, _MAX_UNROLL * CW)
            plan = (1, min(tw, W))
        if plan is not None:
            BT, TW = plan
            block = (BT * H, TW)
            grid = (NC // BT, pl.cdiv(W, TW))
            out = _run(x.reshape(NC * H, W), weight, H=H, BT=BT, block=block,
                       grid=grid, CW=min(CW, TW),
                       vmem_limit=_vmem_limit(vmem, BT * H * TW * 4))
            return out.reshape(N, C, H, W)

    # ---- lane-dense (transposed) fallback for W far below 128 ---------------
    # TODO(synk): this relayout costs extra HBM passes; only used when W << 128.
    L = NC * W
    xt = jnp.transpose(x, (2, 0, 1, 3)).reshape(H, L)
    TL = max(_LANE, (target // (H * 4)) // _LANE * _LANE)
    TL = min(TL, _MAX_UNROLL * CW)
    if small_vmem and L >= 2 * _LANE:
        TL = min(TL, max(_LANE, ((L + 1) // 2) // _LANE * _LANE))
    if TL >= L:
        TL = L                       # single full-width block (full-dim is legal)
    block = (H, TL)
    grid = (1, pl.cdiv(L, TL))
    out = _run(xt, weight, H=H, BT=1, block=block, grid=grid, CW=min(CW, TL),
               vmem_limit=_vmem_limit(vmem, H * TL * 4))
    return jnp.transpose(out.reshape(H, N, C, W), (1, 2, 0, 3))


# ----------------------------------------------------------------------------
# Pure-JAX reference (matches the PyTorch forward: replicate-pad 7x1 conv)
# ----------------------------------------------------------------------------
def forfilter_reference(x, weight):
    N, C, H, W = x.shape
    xp = jnp.pad(x, ((0, 0), (0, 0), (PAD, PAD), (0, 0)), mode="edge")
    out = jnp.zeros_like(x)
    for k in range(KH):
        out = out + weight[k] * xp[:, :, k:k + H, :]
    return out


if __name__ == "__main__":
    key = jax.random.PRNGKey(0)
    kx, kw, kx2 = jax.random.split(key, 3)

    # Deterministic weight init for nn.Conv2d(1, 1, (7, 1), bias=False):
    # weight shape (1, 1, 7, 1) -> keep the 7-tap vector.
    fan_in = 1 * KH * 1
    bound = 1.0 / (fan_in ** 0.5)
    weight = jax.random.uniform(kw, (KH,), dtype=jnp.float32,
                                minval=-bound, maxval=bound)

    # Small-W case (exercises the lane-dense transposed fallback).
    N, C, H, W = 2, 4, 16, 16
    x = jax.random.normal(kx, (N, C, H, W), dtype=jnp.float32)
    out = jax.block_until_ready(forfilter(x, weight))
    ref = forfilter_reference(x, weight)
    assert out.shape == (N, C, H, W)
    assert jnp.allclose(out, ref, atol=1e-5, rtol=1e-5)

    # Wide case (exercises the native-layout path: W in lanes, BT images/block).
    N2, C2, H2, W2 = 1, 2, 64, 256
    x2 = jax.random.normal(kx2, (N2, C2, H2, W2), dtype=jnp.float32)
    out2 = jax.block_until_ready(forfilter(x2, weight))
    ref2 = forfilter_reference(x2, weight)
    assert out2.shape == (N2, C2, H2, W2)
    assert jnp.allclose(out2, ref2, atol=1e-5, rtol=1e-5)

    print("KERNEL_OK")
</pallas_src>

<mosaic_0001>
module attributes {stable_mosaic.version = 11 : i64} {
  func.func @kernel(%arg0: i32, %arg1: i32, %arg2: memref<7xf32, #tpu.memory_space<smem>>, %arg3: memref<16x128xf32, #tpu.memory_space<vmem>>, %arg4: memref<16x128xf32, #tpu.memory_space<vmem>>) attributes {dimension_semantics = [#tpu.dimension_semantics<parallel>, #tpu.dimension_semantics<parallel>], iteration_bounds = array<i64: 1, 1>, scalar_prefetch = 0 : i64, scratch_operands = 0 : i64, tpu.core_type = #tpu.core_type<tc>, window_params = [{transform_indices = @transform_0, window_bounds = array<i64: 7>}, {transform_indices = @transform_1, window_bounds = array<i64: 16, 128>}, {transform_indices = @transform_2, window_bounds = array<i64: 16, 128>}]} {
    %c0 = arith.constant 0 : index
    %0 = memref.load %arg2[%c0] : memref<7xf32, #tpu.memory_space<smem>>
    %c1 = arith.constant 1 : index
    %1 = memref.load %arg2[%c1] : memref<7xf32, #tpu.memory_space<smem>>
    %c2 = arith.constant 2 : index
    %2 = memref.load %arg2[%c2] : memref<7xf32, #tpu.memory_space<smem>>
    %c3 = arith.constant 3 : index
    %3 = memref.load %arg2[%c3] : memref<7xf32, #tpu.memory_space<smem>>
    %c4 = arith.constant 4 : index
    %4 = memref.load %arg2[%c4] : memref<7xf32, #tpu.memory_space<smem>>
    %c5 = arith.constant 5 : index
    %5 = memref.load %arg2[%c5] : memref<7xf32, #tpu.memory_space<smem>>
    %c6 = arith.constant 6 : index
    %6 = memref.load %arg2[%c6] : memref<7xf32, #tpu.memory_space<smem>>
    %c0_0 = arith.constant 0 : index
    %c0_1 = arith.constant 0 : index
    %7 = vector.load %arg3[%c0_0, %c0_1] : memref<16x128xf32, #tpu.memory_space<vmem>>, vector<16x128xf32>
    %8 = vector.broadcast %3 : f32 to vector<16x128xf32>
    %9 = arith.mulf %8, %7 : vector<16x128xf32>
    %10 = tpu.iota {dimensions = array<i32: 0>} : vector<16x128xi32>
    %11 = vector.extract_strided_slice %7 {offsets = [0, 0], sizes = [1, 128], strides = [1, 1]} : vector<16x128xf32> to vector<1x128xf32>
    %12 = vector.shape_cast %11 : vector<1x128xf32> to vector<1x128xf32>
    %13 = vector.broadcast %12 : vector<1x128xf32> to vector<16x128xf32>
    %14 = vector.extract_strided_slice %7 {offsets = [15, 0], sizes = [1, 128], strides = [1, 1]} : vector<16x128xf32> to vector<1x128xf32>
    %15 = vector.shape_cast %14 : vector<1x128xf32> to vector<1x128xf32>
    %16 = vector.broadcast %15 : vector<1x128xf32> to vector<16x128xf32>
    %c3_i32 = arith.constant 3 : i32
    %17 = tpu.dynamic_rotate %7 by %c3_i32 dim 0 : vector<16x128xf32>, i32 -> vector<16x128xf32>
    %c3_i32_2 = arith.constant 3 : i32
    %18 = vector.broadcast %c3_i32_2 : i32 to vector<16x128xi32>
    %19 = arith.cmpi sge, %10, %18 : vector<16x128xi32>
    %20 = arith.select %19, %17, %13 : vector<16x128xi1>, vector<16x128xf32>
    %21 = vector.broadcast %0 : f32 to vector<16x128xf32>
    %22 = arith.mulf %21, %20 : vector<16x128xf32>
    %23 = arith.addf %9, %22 : vector<16x128xf32>
    %c2_i32 = arith.constant 2 : i32
    %24 = tpu.dynamic_rotate %7 by %c2_i32 dim 0 : vector<16x128xf32>, i32 -> vector<16x128xf32>
    %c2_i32_3 = arith.constant 2 : i32
    %25 = vector.broadcast %c2_i32_3 : i32 to vector<16x128xi32>
    %26 = arith.cmpi sge, %10, %25 : vector<16x128xi32>
    %27 = arith.select %26, %24, %13 : vector<16x128xi1>, vector<16x128xf32>
    %28 = vector.broadcast %1 : f32 to vector<16x128xf32>
    %29 = arith.mulf %28, %27 : vector<16x128xf32>
    %30 = arith.addf %23, %29 : vector<16x128xf32>
    %c1_i32 = arith.constant 1 : i32
    %31 = tpu.dynamic_rotate %7 by %c1_i32 dim 0 : vector<16x128xf32>, i32 -> vector<16x128xf32>
    %c1_i32_4 = arith.constant 1 : i32
    %32 = vector.broadcast %c1_i32_4 : i32 to vector<16x128xi32>
    %33 = arith.cmpi sge, %10, %32 : vector<16x128xi32>
    %34 = arith.select %33, %31, %13 : vector<16x128xi1>, vector<16x128xf32>
    %35 = vector.broadcast %2 : f32 to vector<16x128xf32>
    %36 = arith.mulf %35, %34 : vector<16x128xf32>
    %37 = arith.addf %30, %36 : vector<16x128xf32>
    %c15_i32 = arith.constant 15 : i32
    %38 = tpu.dynamic_rotate %7 by %c15_i32 dim 0 : vector<16x128xf32>, i32 -> vector<16x128xf32>
    %c15_i32_5 = arith.constant 15 : i32
    %39 = vector.broadcast %c15_i32_5 : i32 to vector<16x128xi32>
    %40 = arith.cmpi slt, %10, %39 : vector<16x128xi32>
    %41 = arith.select %40, %38, %16 : vector<16x128xi1>, vector<16x128xf32>
    %42 = vector.broadcast %4 : f32 to vector<16x128xf32>
    %43 = arith.mulf %42, %41 : vector<16x128xf32>
    %44 = arith.addf %37, %43 : vector<16x128xf32>
    %c14_i32 = arith.constant 14 : i32
    %45 = tpu.dynamic_rotate %7 by %c14_i32 dim 0 : vector<16x128xf32>, i32 -> vector<16x128xf32>
    %c14_i32_6 = arith.constant 14 : i32
    %46 = vector.broadcast %c14_i32_6 : i32 to vector<16x128xi32>
    %47 = arith.cmpi slt, %10, %46 : vector<16x128xi32>
    %48 = arith.select %47, %45, %16 : vector<16x128xi1>, vector<16x128xf32>
    %49 = vector.broadcast %5 : f32 to vector<16x128xf32>
    %50 = arith.mulf %49, %48 : vector<16x128xf32>
    %51 = arith.addf %44, %50 : vector<16x128xf32>
    %c13_i32 = arith.constant 13 : i32
    %52 = tpu.dynamic_rotate %7 by %c13_i32 dim 0 : vector<16x128xf32>, i32 -> vector<16x128xf32>
    %c13_i32_7 = arith.constant 13 : i32
    %53 = vector.broadcast %c13_i32_7 : i32 to vector<16x128xi32>
    %54 = arith.cmpi slt, %10, %53 : vector<16x128xi32>
    %55 = arith.select %54, %52, %16 : vector<16x128xi1>, vector<16x128xf32>
    %56 = vector.broadcast %6 : f32 to vector<16x128xf32>
    %57 = arith.mulf %56, %55 : vector<16x128xf32>
    %58 = arith.addf %51, %57 : vector<16x128xf32>
    %c0_8 = arith.constant 0 : index
    %c0_9 = arith.constant 0 : index
    %59 = vector.load %arg4[%c0_8, %c0_9] : memref<16x128xf32, #tpu.memory_space<vmem>>, vector<16x128xf32>
    tpu.vector_store %arg4[%c0_8, %c0_9], %58 {strides = array<i32>} : memref<16x128xf32, #tpu.memory_space<vmem>>, vector<16x128xf32>,
    return
  }
  func.func @transform_0(%arg0: i32, %arg1: i32) -> i32 {
    %c0_i32 = arith.constant 0 : i32
    %c0_i32_0 = arith.constant 0 : i32
    return %c0_i32 : i32
  }
  func.func @transform_1(%arg0: i32, %arg1: i32) -> (i32, i32) {
    %c0_i32 = arith.constant 0 : i32
    return %arg0, %arg1 : i32, i32
  }
  func.func @transform_2(%arg0: i32, %arg1: i32) -> (i32, i32) {
    %c0_i32 = arith.constant 0 : i32
    return %arg0, %arg1 : i32, i32
  }
}

</mosaic_0001>

<bundles_post_ra>
// kernel: tpu_custom_call.1
= control target key start
LH: loop header
LB: loop body
LE: loop exit
PB: predicated region body
PF: predicated region fallthrough
CT: control target
= control target key end

     0   :  { %7 = vsyncpa [#allocation5], 0  ;;  %s378_s0 = inlined_call_operand.hbm [shape: f32[7], index: 0, kind: input, shape index: {}]   ;;  %s379_s1 = inlined_call_operand.hbm [shape: f32[16,128], index: 1, kind: input, shape index: {}]   ;;  %s380_s2 = inlined_call_operand.hbm [shape: f32[16,128], index: 2, kind: output, shape index: {}]  }
   0x1   :  { %8 = vsyncpa [#allocation3], 0 }
   0x2   :  { %9 = vsyncpa [#allocation4], 0  ;;  %s175_s11 = scalar_lea.hbm %s378_s0, 16 }
   0x3   :  { %p176_p0 = scmp.ne.s32.totalorder %s378_s0, %s175_s11  ;;  %p179_p1 = scmp.lt.u32.totalorder %s175_s11, %s378_s0 }
   0x5   :  { %p181_p2 = pnand %p179_p1, %p176_p0 }
   0x7   :  { %184 = shalt.err (!%p181_p2)
}
   0x8   :  { %s235_s16 = smov [#allocation2]   ;;  %s236_s19 = smov [#allocation6]  }
   0x9   :  { %17 = dma.hbm_to_smem %s378_s0, 16, %s235_s16, [#allocation5]  }
   0xa   :  { %s23_s20 = sshll.u32 %s236_s19, 4  ;;  %s185_s23 = scalar_lea.hbm %s379_s1, 256  ;;  %s24_s20 = int_to_ptr.vmem [resolvable:$true] %s23_s20 }
   0xb   :  { %p186_p3 = scmp.ne.s32.totalorder %s379_s1, %s185_s23  ;;  %p189_p4 = scmp.lt.u32.totalorder %s185_s23, %s379_s1 }
   0xd   :  { %p191_p5 = pnand %p189_p4, %p186_p3 }
   0xf   :  { %194 = shalt.err (!%p191_p5)
}
  0x10   :  { %s195_s28 = scalar_lea.vmem %s24_s20, 256  ;;  %p200_p7 = scmp.lt.s32.totalorder %s24_s20, %s24_s20 }
  0x11   :  { %p196_p6 = scmp.ne.s32.totalorder %s24_s20, %s195_s28  ;;  %p201_p8 = scmp.lt.s32.totalorder %s195_s28, %s195_s28 }
  0x13   :  { %p202_p9 = por %p201_p8, %p200_p7 }
  0x15   :  { %p203_p10 = pnand %p202_p9, %p196_p6 }
  0x17   :  { %206 = shalt.err (!%p203_p10)
}
  0x18   :  { %s237_s0 = smov 128   ;;  %s238_s29 = smov 8  }
  0x19   :  { %29 = dma.hbm_to_vmem [thread:$0]  %s379_s1, 256, %s24_s20, [#allocation3], %s237_s0, %s237_s0, %s238_s29  }
  0x1a   :  { %229 = dma.done.wait [#allocation5], 16  }
  0x1b   :  { %230 = vsyncadd [#allocation5], 4294967280 }
  0x1c   :  { %231 = dma.done.wait [#allocation3], 256  }
  0x1d   :  { %232 = vsyncadd [#allocation3], 4294967040 }
  0x1e   :  { %36 = sfence }
  0x1f   :  { %s282_s4 = sld [smem:[#allocation2]]  ;;  %s284_s5 = sld [smem:[#allocation2 + $0x1]]  ;;  %v286_v0 = vld [vmem:[#allocation6] sm:$0xff]  ;;  %v288_v1 = vld [vmem:[#allocation6 + $0x8] sm:$0xff]  ;;  %v49_v2 = vlaneseq }
  0x20   :  { %s290_s6 = sld [smem:[#allocation2 + $0x2]]  ;;  %s292_s7 = sld [smem:[#allocation2 + $0x3]]  ;;  %v60_v3 = vrot.slane %v286_v0, 5  ;;  %v61_v4 = vrot.slane %v288_v1, 5  ;;  %v74_v6 = vrot.slane %v286_v0, 6  ;;  %v75_v7 = vrot.slane %v288_v1, 6 }
  0x21   :  { %s296_s1 = sld [smem:[#allocation2 + $0x4]]  ;;  %v298_v5 = vshrl.u32 %v49_v2, 7  ;;  %s301_s8 = sld [smem:[#allocation2 + $0x5]]  ;;  %v88_v8 = vrot.slane %v286_v0, 7  ;;  %v89_v9 = vrot.slane %v288_v1, 7  ;;  %v102_v10 = vrot.slane %v286_v0, 1 }
  0x22   :  { %s311_s9 = sld [smem:[#allocation2 + $0x6]]  ;;  %v103_v20 = vrot.slane %v288_v1, 1  ;;  %v116_v30 = vrot.slane %v286_v0, 2  ;;  %v117_v31 = vrot.slane %v288_v1, 2  ;;  %v130_v36 = vrot.slane %v286_v0, 3  ;;  %s239_s10 = smov [#allocation7]  }
  0x23   :  { %v54_v11 = vsub.s32 0, %v298_v5  ;;  %vm62_vm0 = vcmp.lt.s32.totalorder %v298_v5, 3  ;;  %vm65_vm1 = vcmp.ge.s32.totalorder %v298_v5, 3  ;;  %vm76_vm2 = vcmp.lt.s32.totalorder %v298_v5, 2  ;;  %s151_s11 = sshll.u32 %s239_s10, 4  ;;  %s152_s11 = int_to_ptr.vmem [resolvable:$true] %s151_s11 }
  0x24   :  { %v64_v12 = vsel %vm62_vm0, %v61_v4, %v60_v3  ;;  %v78_v13 = vsel %vm76_vm2, %v75_v7, %v74_v6  ;;  %vm79_vm3 = vcmp.ge.s32.totalorder %v298_v5, 2  ;;  %vm90_vm4 = vcmp.lt.s32.totalorder %v298_v5, 1  ;;  %s207_s12 = scalar_lea.vmem %s152_s11, 256  ;;  %p212_p12 = scmp.lt.s32.totalorder %s152_s11, %s152_s11 }
  0x25   :  { %v55_v14 = vrot.slane %v286_v0, %v54_v11  ;;  %v69_v15 = vstv %s282_s4  ;;  %v83_v16 = vstv %s284_s5  ;;  %v92_v17 = vsel %vm90_vm4, %v89_v9, %v88_v8  ;;  %p208_p11 = scmp.ne.s32.totalorder %s152_s11, %s207_s12  ;;  %p213_p13 = scmp.lt.s32.totalorder %s207_s12, %s207_s12 }
  0x26   :  { %v46_v18 = vstv %s292_s7  ;;  %vm93_vm5 = vcmp.ge.s32.totalorder %v298_v5, 1  ;;  %v97_v19 = vstv %s290_s6  ;;  %vm104_vm6 = vcmp.lt.s32.totalorder %v298_v5, 7 }
  0x27   :  { %v47_v21 = vmul.f32 %v46_v18, %v286_v0  ;;  %v67_v22 = vsel %vm65_vm1, %v64_v12, %v55_v14  ;;  %v81_v23 = vsel %vm79_vm3, %v78_v13, %v55_v14  ;;  %v95_v24 = vsel %vm93_vm5, %v92_v17, %v55_v14  ;;  %p214_p0 = por %p213_p13, %p212_p12 }
  0x28   :  { %v70_v25 = vmul.f32 %v69_v15, %v67_v22  ;;  %v84_v26 = vmul.f32 %v83_v16, %v81_v23  ;;  %v98_v27 = vmul.f32 %v97_v19, %v95_v24  ;;  %v105_v28 = vsel %vm104_vm6, %v102_v10, %v103_v20 }
  0x29   :  { %v111_v29 = vstv %s296_s1  ;;  %vm118_vm7 = vcmp.lt.s32.totalorder %v298_v5, 6  ;;  %v125_v34 = vstv %s301_s8  ;;  %v131_v37 = vrot.slane %v288_v1, 3  ;;  %p215_p1 = pnand %p214_p0, %p208_p11 }
  0x2a   :  { %v72_v32 = vadd.f32 %v70_v25, %v47_v21  ;;  %v112_v33 = vmul.f32 %v111_v29, %v105_v28  ;;  %v119_v35 = vsel %vm118_vm7, %v116_v30, %v117_v31  ;;  %vm132_vm8 = vcmp.lt.s32.totalorder %v298_v5, 5 }
  0x2b   :  { %v126_v39 = vmul.f32 %v125_v34, %v119_v35  ;;  %v139_v40 = vstv %s311_s9  ;;  %v48_v41 = vmul.f32 %v46_v18, %v288_v1  ;;  %v133_v42 = vsel %vm132_vm8, %v130_v36, %v131_v37 }
  0x2c   :  { %v86_v38 = vadd.f32 %v84_v26, %v72_v32  ;;  %v51_v43 = vadd.s32 8, %v298_v5  ;;  %v58_v44 = vsub.s32 7, %v298_v5  ;;  %v63_v45 = vsel %vm62_vm0, %v60_v3, %v61_v4 }
  0x2d   :  { %v140_v47 = vmul.f32 %v139_v40, %v133_v42  ;;  %v71_v48 = vmul.f32 %v69_v15, %v63_v45  ;;  %v77_v49 = vsel %vm76_vm2, %v74_v6, %v75_v7  ;;  %v91_v52 = vsel %vm90_vm4, %v88_v8, %v89_v9 }
  0x2e   :  { %v100_v46 = vadd.f32 %v98_v27, %v86_v38  ;;  %v59_v50 = vrot.slane %v288_v1, %v58_v44  ;;  %v85_v51 = vmul.f32 %v83_v16, %v77_v49  ;;  %v106_v53 = vsel %vm104_vm6, %v103_v20, %v102_v10 }
  0x2f   :  { %v73_v55 = vadd.f32 %v71_v48, %v48_v41  ;;  %v99_v56 = vmul.f32 %v97_v19, %v91_v52  ;;  %vm108_vm9 = vcmp.lt.s32.totalorder %v51_v43, 15  ;;  %v120_v58 = vsel %vm118_vm7, %v117_v31, %v116_v30 }
  0x30   :  { %v114_v54 = vadd.f32 %v112_v33, %v100_v46  ;;  %v110_v57 = vsel %vm108_vm9, %v106_v53, %v59_v50  ;;  %vm122_vm10 = vcmp.lt.s32.totalorder %v51_v43, 14  ;;  %v134_v59 = vsel %vm132_vm8, %v131_v37, %v130_v36 }
  0x31   :  { %v87_v61 = vadd.f32 %v85_v51, %v73_v55  ;;  %v113_v62 = vmul.f32 %v111_v29, %v110_v57  ;;  %v124_v63 = vsel %vm122_vm10, %v120_v58, %v59_v50  ;;  %vm136_vm11 = vcmp.lt.s32.totalorder %v51_v43, 13 }
  0x32   :  { %v128_v60 = vadd.f32 %v126_v39, %v114_v54  ;;  %v127_v2 = vmul.f32 %v125_v34, %v124_v63  ;;  %v138_v3 = vsel %vm136_vm11, %v134_v59, %v59_v50 }
  0x33   :  { %v101_v1 = vadd.f32 %v99_v56, %v87_v61  ;;  %v141_v6 = vmul.f32 %v139_v40, %v138_v3 }
  0x34   :  { %v142_v0 = vadd.f32 %v140_v47, %v128_v60 }
  0x35   :  { %v115_v4 = vadd.f32 %v113_v62, %v101_v1 }
  0x36   :  { %144 = vst [vmem:[#allocation7] sm:$0xff] %v142_v0 }
  0x37   :  { %v129_v7 = vadd.f32 %v127_v2, %v115_v4 }
  0x39   :  { %v143_v8 = vadd.f32 %v141_v6, %v129_v7 }
  0x3b   :  { %145 = vst [vmem:[#allocation7 + $0x8] sm:$0xff] %v143_v8 }
  0x3c   :  { %218 = shalt.err (!%p215_p1)
}
  0x3d   :  { %s219_s15 = scalar_lea.hbm %s380_s2, 256 }
  0x3e   :  { %p220_p2 = scmp.ne.s32.totalorder %s380_s2, %s219_s15  ;;  %p223_p3 = scmp.lt.u32.totalorder %s219_s15, %s380_s2 }
  0x40   :  { %p225_p4 = pnand %p223_p3, %p220_p2 }
  0x42   :  { %228 = shalt.err (!%p225_p4)
}
  0x43   :  { %157 = dma.vmem_to_hbm [thread:$0]  %s152_s11, 256, %s380_s2, [#allocation4], %s237_s0, %s237_s0, %s238_s29  }
  0x44   :  { %233 = dma.done.wait [#allocation4], 256  }
  0x45   :  { %234 = vsyncadd [#allocation4], 4294967040 }
  0x46   :  { %161 = vsyncpa [#allocation3], 1 }
  0x47   :  { %162 = vsyncpa [#allocation4], 1 }
  0x48   :  { %163 = vsyncpa [#allocation5], 1 }

</bundles_post_ra>
